<compile_context>
chip_gen: v5e
topology: v5e:2x2
jax: 0.10.0
libtpu: 0.0.40
codegen_flags: <defaults>
</compile_context>

<pallas_src>
import jax
import jax.numpy as jnp
from jax.experimental import pallas as pl
from jax.experimental.pallas import tpu as pltpu


_HEAD_DIMS = (2, 3, 3, 2)      # quad_scores, center, normal_vector, size
_C_OUT = sum(_HEAD_DIMS)       # 10 real output channels
_C_PAD = 16                    # padded to a sublane multiple for clean stores


def _quad_head_kernel(x_ref, w1_ref, b1_ref, w2_ref, b2_ref, wh_ref, bh_ref,
                      out_ref):
    # x: (H, tn)  -- channels on sublanes, sequence tile on lanes.
    x = x_ref[...]

    # net = relu(bn1(conv1(net)))   (BN folded into w1/b1)
    h = jnp.dot(w1_ref[...], x, preferred_element_type=jnp.float32) + b1_ref[...]
    h = jnp.maximum(h, 0.0)

    # net = relu(bn2(conv2(net)))   (BN folded into w2/b2)
    h = jnp.dot(w2_ref[...], h.astype(w2_ref.dtype),
                preferred_element_type=jnp.float32) + b2_ref[...]
    h = jnp.maximum(h, 0.0)

    # all four 1x1-conv heads fused into one (16, H) matmul, lane-dense output
    out = jnp.dot(wh_ref[...], h.astype(wh_ref.dtype),
                  preferred_element_type=jnp.float32) + bh_ref[...]
    out_ref[...] = out.astype(out_ref.dtype)


def _pick_tile(N):
    for cand in (2048, 1024, 512, 256, 128):
        if N >= cand:
            return cand
    return N        # tiny sequences: one full-width block (no (8,128) constraint)


def quad_predict_head(net_ncl, base_xyz, params, end_points=None, prefix="",
                      *, tn=None, compute_dtype=jnp.float32):
    """net_ncl: (B, H, N) float32 (PyTorch NCL layout);  base_xyz: (B, N, 3)."""
    if end_points is None:
        end_points = {}
    B, H, N = net_ncl.shape
    if tn is None:
        tn = _pick_tile(N)

    p = params
    eps = 1e-5

    # ---- fold BatchNorm (inference) into the conv weights/biases ----
    s1 = p["bn1_gamma"] / jnp.sqrt(p["bn1_var"] + eps)          # (H,)
    s2 = p["bn2_gamma"] / jnp.sqrt(p["bn2_var"] + eps)
    w1f = (p["w1"] * s1[:, None]).astype(compute_dtype)         # (H, H) out x in
    b1f = (p["b1"] * s1 + p["bn1_beta"] - p["bn1_mean"] * s1).reshape(H, 1)
    w2f = (p["w2"] * s2[:, None]).astype(compute_dtype)
    b2f = (p["b2"] * s2 + p["bn2_beta"] - p["bn2_mean"] * s2).reshape(H, 1)

    # ---- fuse the four head weights into one padded (16, H) matrix ----
    wh = jnp.concatenate(
        [p["w_scores"], p["w_center"], p["w_normal"], p["w_size"]], axis=0)  # (10, H)
    bh = jnp.concatenate(
        [p["b_scores"], p["b_center"], p["b_normal"], p["b_size"]], axis=0)  # (10,)
    whp = jnp.zeros((_C_PAD, H), jnp.float32).at[:_C_OUT].set(wh).astype(compute_dtype)
    bhp = jnp.zeros((_C_PAD, 1), jnp.float32).at[:_C_OUT, 0].set(bh)

    x = net_ncl.astype(compute_dtype)                           # (B, H, N), no transpose
    base_xyz = base_xyz.astype(jnp.float32)

    # ---- pad ragged sequence length up to a tile multiple ----
    if tn >= 128:
        n_blocks = -(-N // tn)                                   # ceil div (static)
        N_pad = n_blocks * tn
    else:
        n_blocks, N_pad = 1, N
    if N_pad != N:
        x = jnp.pad(x, ((0, 0), (0, 0), (0, N_pad - N)))

    def xmap(b, n):
        return (b, 0, n)

    def wmap(b, n):
        return (0, 0)

    in_specs = [
        pl.BlockSpec((None, H, tn), xmap),                        # net tile (H, tn)
        pl.BlockSpec((H, H), wmap), pl.BlockSpec((H, 1), wmap),   # conv1+bn1 folded
        pl.BlockSpec((H, H), wmap), pl.BlockSpec((H, 1), wmap),   # conv2+bn2 folded
        pl.BlockSpec((_C_PAD, H), wmap), pl.BlockSpec((_C_PAD, 1), wmap),  # fused heads
    ]
    out_spec = pl.BlockSpec((None, _C_PAD, tn), xmap)
    out_shape = jax.ShapeDtypeStruct((B, _C_PAD, N_pad), jnp.float32)

    fused = pl.pallas_call(
        _quad_head_kernel,
        out_shape=out_shape,
        grid_spec=pltpu.PrefetchScalarGridSpec(
            num_scalar_prefetch=0,
            grid=(B, n_blocks),
            in_specs=in_specs,
            out_specs=out_spec,
        ),
        compiler_params=pltpu.CompilerParams(
            dimension_semantics=("parallel", "parallel")),
    )(x, w1f, b1f, w2f, b2f, whp, bhp)                           # (B, 16, N_pad)

    # ---- tiny glue JAX: split heads, add base_xyz, global-norm normalize ----
    out = jnp.transpose(fused[:, :, :N], (0, 2, 1))              # (B, N, 16)
    scores = out[..., 0:2]
    center = out[..., 2:5] + base_xyz
    normal_raw = out[..., 5:8]
    size = out[..., 8:10]
    # torch.norm(normal_vector, p=2) is a GLOBAL (whole tensor) Frobenius norm:
    # a scalar cross-block reduction over a tiny (B, N, 3) tensor -> glue JAX.
    normal = normal_raw / jnp.linalg.norm(normal_raw)

    end_points[f"{prefix}quad_scores"] = scores
    end_points[f"{prefix}quad_center"] = center
    end_points[f"{prefix}normal_vector"] = normal
    end_points[f"{prefix}quad_size"] = size
    return center, size, end_points


def _reference(net_ncl, base_xyz, p):
    """Pure-JAX reference mirroring the PyTorch forward (eval-mode BN)."""
    eps = 1e-5
    x = jnp.transpose(net_ncl, (0, 2, 1))                        # (B, N, H)
    s1 = p["bn1_gamma"] / jnp.sqrt(p["bn1_var"] + eps)
    t1 = p["bn1_beta"] - p["bn1_mean"] * s1
    s2 = p["bn2_gamma"] / jnp.sqrt(p["bn2_var"] + eps)
    t2 = p["bn2_beta"] - p["bn2_mean"] * s2
    h = jnp.maximum((x @ p["w1"].T + p["b1"]) * s1 + t1, 0.0)
    h = jnp.maximum((h @ p["w2"].T + p["b2"]) * s2 + t2, 0.0)
    scores = h @ p["w_scores"].T + p["b_scores"]
    center = h @ p["w_center"].T + p["b_center"] + base_xyz
    normal = h @ p["w_normal"].T + p["b_normal"]
    normal = normal / jnp.linalg.norm(normal)
    size = h @ p["w_size"].T + p["b_size"]
    return scores, center, normal, size


def _make_params(key, hidden_dim):
    H = hidden_dim
    ks = jax.random.split(key, 20)

    def w(k, shape, scale=0.1):
        return (scale * jax.random.normal(k, shape)).astype(jnp.float32)

    return {
        # torch Conv1d(k=1) weight layout: (C_out, C_in) == weight[:, :, 0]
        "w1": w(ks[0], (H, H)), "b1": w(ks[1], (H,)),
        "w2": w(ks[2], (H, H)), "b2": w(ks[3], (H,)),
        "w_scores": w(ks[4], (2, H)), "b_scores": w(ks[5], (2,)),
        "w_center": w(ks[6], (3, H)), "b_center": w(ks[7], (3,)),
        "w_normal": w(ks[8], (3, H)), "b_normal": w(ks[9], (3,)),
        "w_size": w(ks[10], (2, H)), "b_size": w(ks[11], (2,)),
        "bn1_gamma": (1.0 + 0.1 * jax.random.normal(ks[12], (H,))).astype(jnp.float32),
        "bn1_beta": w(ks[13], (H,)),
        "bn1_mean": w(ks[14], (H,)),
        "bn1_var": jax.random.uniform(ks[15], (H,), minval=0.5, maxval=1.5).astype(jnp.float32),
        "bn2_gamma": (1.0 + 0.1 * jax.random.normal(ks[16], (H,))).astype(jnp.float32),
        "bn2_beta": w(ks[17], (H,)),
        "bn2_mean": w(ks[18], (H,)),
        "bn2_var": jax.random.uniform(ks[19], (H,), minval=0.5, maxval=1.5).astype(jnp.float32),
    }


if __name__ == "__main__":
    key = jax.random.PRNGKey(0)
    k_net, k_xyz, k_par = jax.random.split(key, 3)

    B, H, N = 2, 32, 256          # batch, hidden_dim, num proposals (seq)
    net = jax.random.normal(k_net, (B, H, N), dtype=jnp.float32)      # NCL
    base_xyz = jax.random.normal(k_xyz, (B, N, 3), dtype=jnp.float32)
    params = _make_params(k_par, H)

    # f32 path (matches PyTorch numerics); tn=128 exercises the seq tiling.
    center, size, end_points = quad_predict_head(
        net, base_xyz, params, end_points={}, prefix="proposal_", tn=128)
    jax.block_until_ready((center, size))

    # correctness check against pure-JAX reference
    ref_scores, ref_center, ref_normal, ref_size = _reference(net, base_xyz, params)
    assert jnp.allclose(end_points["proposal_quad_scores"], ref_scores, atol=1e-4, rtol=1e-4)
    assert jnp.allclose(end_points["proposal_quad_center"], ref_center, atol=1e-4, rtol=1e-4)
    assert jnp.allclose(end_points["proposal_normal_vector"], ref_normal, atol=1e-4, rtol=1e-4)
    assert jnp.allclose(end_points["proposal_quad_size"], ref_size, atol=1e-4, rtol=1e-4)

    # ragged sequence length (N not a tile multiple) -> wrapper pads / slices
    Nr = 200
    net_r = jax.random.normal(k_net, (B, H, Nr), dtype=jnp.float32)
    xyz_r = jax.random.normal(k_xyz, (B, Nr, 3), dtype=jnp.float32)
    c_r, s_r, ep_r = quad_predict_head(
        net_r, xyz_r, params, end_points={}, prefix="ragged_", tn=128)
    jax.block_until_ready((c_r, s_r))
    r_sc, r_ce, r_no, r_sz = _reference(net_r, xyz_r, params)
    assert jnp.allclose(ep_r["ragged_quad_scores"], r_sc, atol=1e-4, rtol=1e-4)
    assert jnp.allclose(ep_r["ragged_quad_center"], r_ce, atol=1e-4, rtol=1e-4)
    assert jnp.allclose(ep_r["ragged_normal_vector"], r_no, atol=1e-4, rtol=1e-4)
    assert jnp.allclose(ep_r["ragged_quad_size"], r_sz, atol=1e-4, rtol=1e-4)

    # bf16 MXU path (f32 accumulation) smoke run — recommended on v6e/v5e.
    c_bf16, s_bf16, _ = quad_predict_head(
        net, base_xyz, params, end_points={}, prefix="bf16_", tn=128,
        compute_dtype=jnp.bfloat16)
    jax.block_until_ready((c_bf16, s_bf16))

    print("KERNEL_OK")
</pallas_src>

<mosaic_0001>
module attributes {stable_mosaic.version = 11 : i64} {
  func.func @_quad_head_kernel(%arg0: i32, %arg1: i32, %arg2: memref<1x32x128xf32, #tpu.memory_space<vmem>>, %arg3: memref<32x32xf32, #tpu.memory_space<vmem>>, %arg4: memref<32x1xf32, #tpu.memory_space<vmem>>, %arg5: memref<32x32xf32, #tpu.memory_space<vmem>>, %arg6: memref<32x1xf32, #tpu.memory_space<vmem>>, %arg7: memref<16x32xf32, #tpu.memory_space<vmem>>, %arg8: memref<16x1xf32, #tpu.memory_space<vmem>>, %arg9: memref<1x16x128xf32, #tpu.memory_space<vmem>>) attributes {dimension_semantics = [#tpu.dimension_semantics<parallel>, #tpu.dimension_semantics<parallel>], iteration_bounds = array<i64: 2, 2>, scalar_prefetch = 0 : i64, scratch_operands = 0 : i64, tpu.core_type = #tpu.core_type<tc>, window_params = [{transform_indices = @transform_0, window_bounds = array<i64: 1, 32, 128>}, {pipeline_mode = #tpu.pipeline_mode<synchronous>, transform_indices = @transform_1, window_bounds = array<i64: 32, 32>}, {pipeline_mode = #tpu.pipeline_mode<synchronous>, transform_indices = @transform_2, window_bounds = array<i64: 32, 1>}, {pipeline_mode = #tpu.pipeline_mode<synchronous>, transform_indices = @transform_3, window_bounds = array<i64: 32, 32>}, {pipeline_mode = #tpu.pipeline_mode<synchronous>, transform_indices = @transform_4, window_bounds = array<i64: 32, 1>}, {pipeline_mode = #tpu.pipeline_mode<synchronous>, transform_indices = @transform_5, window_bounds = array<i64: 16, 32>}, {pipeline_mode = #tpu.pipeline_mode<synchronous>, transform_indices = @transform_6, window_bounds = array<i64: 16, 1>}, {transform_indices = @transform_7, window_bounds = array<i64: 1, 16, 128>}]} {
    %c0 = arith.constant 0 : index
    %c0_0 = arith.constant 0 : index
    %c0_1 = arith.constant 0 : index
    %0 = vector.load %arg2[%c0, %c0_0, %c0_1] : memref<1x32x128xf32, #tpu.memory_space<vmem>>, vector<1x32x128xf32>
    %1 = vector.shape_cast %0 : vector<1x32x128xf32> to vector<32x128xf32>
    %c0_2 = arith.constant 0 : index
    %c0_3 = arith.constant 0 : index
    %2 = vector.load %arg3[%c0_2, %c0_3] : memref<32x32xf32, #tpu.memory_space<vmem>>, vector<32x32xf32>
    %cst = arith.constant dense<0.000000e+00> : vector<32x128xf32>
    %3 = tpu.matmul %2, %1, %cst {dimension_numbers = #tpu.dot_dimension_numbers<[1], [0], [0], [1], [0, 0, 1, 1], [], []>} : vector<32x32xf32>, vector<32x128xf32>, vector<32x128xf32> -> vector<32x128xf32>
    %c0_4 = arith.constant 0 : index
    %c0_5 = arith.constant 0 : index
    %4 = vector.load %arg4[%c0_4, %c0_5] : memref<32x1xf32, #tpu.memory_space<vmem>>, vector<32x1xf32>
    %5 = vector.broadcast %4 : vector<32x1xf32> to vector<32x128xf32>
    %6 = arith.addf %3, %5 : vector<32x128xf32>
    %cst_6 = arith.constant 0.000000e+00 : f32
    %7 = vector.broadcast %cst_6 : f32 to vector<32x128xf32>
    %8 = arith.maximumf %6, %7 : vector<32x128xf32>
    %c0_7 = arith.constant 0 : index
    %c0_8 = arith.constant 0 : index
    %9 = vector.load %arg5[%c0_7, %c0_8] : memref<32x32xf32, #tpu.memory_space<vmem>>, vector<32x32xf32>
    %cst_9 = arith.constant dense<0.000000e+00> : vector<32x128xf32>
    %10 = tpu.matmul %9, %8, %cst_9 {dimension_numbers = #tpu.dot_dimension_numbers<[1], [0], [0], [1], [0, 0, 1, 1], [], []>} : vector<32x32xf32>, vector<32x128xf32>, vector<32x128xf32> -> vector<32x128xf32>
    %c0_10 = arith.constant 0 : index
    %c0_11 = arith.constant 0 : index
    %11 = vector.load %arg6[%c0_10, %c0_11] : memref<32x1xf32, #tpu.memory_space<vmem>>, vector<32x1xf32>
    %12 = vector.broadcast %11 : vector<32x1xf32> to vector<32x128xf32>
    %13 = arith.addf %10, %12 : vector<32x128xf32>
    %cst_12 = arith.constant 0.000000e+00 : f32
    %14 = vector.broadcast %cst_12 : f32 to vector<32x128xf32>
    %15 = arith.maximumf %13, %14 : vector<32x128xf32>
    %c0_13 = arith.constant 0 : index
    %c0_14 = arith.constant 0 : index
    %16 = vector.load %arg7[%c0_13, %c0_14] : memref<16x32xf32, #tpu.memory_space<vmem>>, vector<16x32xf32>
    %cst_15 = arith.constant dense<0.000000e+00> : vector<16x128xf32>
    %17 = tpu.matmul %16, %15, %cst_15 {dimension_numbers = #tpu.dot_dimension_numbers<[1], [0], [0], [1], [0, 0, 1, 1], [], []>} : vector<16x32xf32>, vector<32x128xf32>, vector<16x128xf32> -> vector<16x128xf32>
    %c0_16 = arith.constant 0 : index
    %c0_17 = arith.constant 0 : index
    %18 = vector.load %arg8[%c0_16, %c0_17] : memref<16x1xf32, #tpu.memory_space<vmem>>, vector<16x1xf32>
    %19 = vector.broadcast %18 : vector<16x1xf32> to vector<16x128xf32>
    %20 = arith.addf %17, %19 : vector<16x128xf32>
    %c0_18 = arith.constant 0 : index
    %c0_19 = arith.constant 0 : index
    %c0_20 = arith.constant 0 : index
    %21 = vector.load %arg9[%c0_18, %c0_19, %c0_20] : memref<1x16x128xf32, #tpu.memory_space<vmem>>, vector<1x16x128xf32>
    %22 = vector.shape_cast %21 : vector<1x16x128xf32> to vector<16x128xf32>
    %23 = vector.shape_cast %20 : vector<16x128xf32> to vector<1x16x128xf32>
    tpu.vector_store %arg9[%c0_18, %c0_19, %c0_20], %23 {strides = array<i32>} : memref<1x16x128xf32, #tpu.memory_space<vmem>>, vector<1x16x128xf32>,
    return
  }
  func.func @transform_0(%arg0: i32, %arg1: i32) -> (i32, i32, i32) {
    %c0_i32 = arith.constant 0 : i32
    %c0_i32_0 = arith.constant 0 : i32
    return %arg0, %c0_i32, %arg1 : i32, i32, i32
  }
  func.func @transform_1(%arg0: i32, %arg1: i32) -> (i32, i32) {
    %c0_i32 = arith.constant 0 : i32
    %c0_i32_0 = arith.constant 0 : i32
    %c0_i32_1 = arith.constant 0 : i32
    return %c0_i32, %c0_i32_0 : i32, i32
  }
  func.func @transform_2(%arg0: i32, %arg1: i32) -> (i32, i32) {
    %c0_i32 = arith.constant 0 : i32
    %c0_i32_0 = arith.constant 0 : i32
    %c0_i32_1 = arith.constant 0 : i32
    return %c0_i32, %c0_i32_0 : i32, i32
  }
  func.func @transform_3(%arg0: i32, %arg1: i32) -> (i32, i32) {
    %c0_i32 = arith.constant 0 : i32
    %c0_i32_0 = arith.constant 0 : i32
    %c0_i32_1 = arith.constant 0 : i32
    return %c0_i32, %c0_i32_0 : i32, i32
  }
  func.func @transform_4(%arg0: i32, %arg1: i32) -> (i32, i32) {
    %c0_i32 = arith.constant 0 : i32
    %c0_i32_0 = arith.constant 0 : i32
    %c0_i32_1 = arith.constant 0 : i32
    return %c0_i32, %c0_i32_0 : i32, i32
  }
  func.func @transform_5(%arg0: i32, %arg1: i32) -> (i32, i32) {
    %c0_i32 = arith.constant 0 : i32
    %c0_i32_0 = arith.constant 0 : i32
    %c0_i32_1 = arith.constant 0 : i32
    return %c0_i32, %c0_i32_0 : i32, i32
  }
  func.func @transform_6(%arg0: i32, %arg1: i32) -> (i32, i32) {
    %c0_i32 = arith.constant 0 : i32
    %c0_i32_0 = arith.constant 0 : i32
    %c0_i32_1 = arith.constant 0 : i32
    return %c0_i32, %c0_i32_0 : i32, i32
  }
  func.func @transform_7(%arg0: i32, %arg1: i32) -> (i32, i32, i32) {
    %c0_i32 = arith.constant 0 : i32
    %c0_i32_0 = arith.constant 0 : i32
    return %arg0, %c0_i32, %arg1 : i32, i32, i32
  }
}

</mosaic_0001>

<bundles_post_ra>
// kernel: tpu_custom_call.1
= control target key start
LH: loop header
LB: loop body
LE: loop exit
PB: predicated region body
PF: predicated region fallthrough
CT: control target
= control target key end

     0   :  { %12 = vsyncpa [#allocation3], 0  ;;  %s1128_s0 = inlined_call_operand.hbm [shape: f32[2,32,256], index: 0, kind: input, shape index: {}]   ;;  %s1129_s1 = inlined_call_operand.vmem [shape: f32[32,32], index: 1, kind: input, shape index: {}]   ;;  %s1130_s2 = inlined_call_operand.vmem [shape: f32[32,1], index: 2, kind: input, shape index: {}]   ;;  %s1131_s3 = inlined_call_operand.vmem [shape: f32[32,32], index: 3, kind: input, shape index: {}]   ;;  %s1132_s4 = inlined_call_operand.vmem [shape: f32[32,1], index: 4, kind: input, shape index: {}]   ;;  %s1133_s5 = inlined_call_operand.vmem [shape: f32[16,32], index: 5, kind: input, shape index: {}]   ;;  %s1134_s6 = inlined_call_operand.vmem [shape: f32[16,1], index: 6, kind: input, shape index: {}]   ;;  %s1135_s7 = inlined_call_operand.hbm [shape: f32[2,16,256], index: 7, kind: output, shape index: {}]  }
   0x1   :  { %14 = vsyncpa [#allocation3 + $0x1], 0 }
   0x2   :  { %15 = vsyncpa [#allocation4], 0 }
   0x3   :  { %17 = vsyncpa [#allocation4 + $0x1], 0  ;;  %s915_s24 = smov 0   ;;  %s917_s25 = smov 0  }
   0x4   :  { %s919_s26 = smov 0   ;;  %s921_s27 = smov 0  }
   0x5   :  { %s923_s28 = smov 0   ;;  %s925_s29 = smov 0  }
   0x6   :  { %s927_s30 = smov 0   ;;  %s929_s8 = smov 0  }
   0x7 LB: > { %1143 = sst [smem:[#allocation8_spill]] %s838_s24  ;;  %s617_s9 = sadd.s32 4294967295, %s866_s8   ;;  %s866_s8 = sphi %s929_s8, %s23_s8   ;;  %s862_s30 = sphi %s927_s30, %s1167_s30   ;;  %s858_s29 = sphi %s925_s29, %s1166_s29   ;;  %s854_s28 = sphi %s923_s28, %s1165_s28   ;;  %s850_s27 = sphi %s921_s27, %s1164_s27   ;;  %s846_s26 = sphi %s919_s26, %s1163_s26   ;;  %s842_s25 = sphi %s917_s25, %s1162_s25   ;;  %s838_s24 = sphi %s915_s24, %s1161_s24  }
   0x8   : > { %1144 = sst [smem:[#allocation9_spill]] %s846_s26  ;;  %s618_s10 = sadd.s32 4294967294, %s866_s8  }
   0x9   : > { %s32_s11 = sadd.s32 1, %s858_s29  ;;  %s35_s12 = sadd.s32 1, %s862_s30 }
   0xa   : > { %p33_p0 = scmp.ge.s32.totalorder %s32_s11, 2  ;;  %s44_s13 = sadd.s32 1, %s846_s26 }
   0xb   : > { %p51_p1 = scmp.ne.s32.totalorder %s846_s26, %s842_s25  ;;  %p52_p2 = scmp.eq.s32.totalorder %s866_s8, 0 }
   0xc   : > { %s1169_s11 = smov (%p33_p0, %s32_s11), 0  ;;  %s1171_s12 = smov (!%p33_p0, %s35_s12), %s862_s30 }
   0xd   : > { %1145 = sst [smem:[#allocation10_spill]] %s1169_s11  ;;  %s40_s14 = ssub.s32 %s858_s29, %s1169_s11 }
   0xe   : > { %p968_p3 = por %p52_p2, %p51_p1  ;;  %p37_p4 = scmp.ge.s32.totalorder %s1171_s12, 2 }
   0xf   : > { %p57_p5 = scmp.ne.s32.totalorder %s842_s25, %s838_s24  ;;  %p58_p6 = scmp.eq.s32.totalorder %s617_s9, 0 }
  0x10   : > { %p209_p7 = scmp.eq.s32.totalorder %s617_s9, 3  ;;  %s1173_s12 = smov (%p37_p4, %s1171_s12), 0 }
  0x11   : > { %1147 = sst [smem:[#allocation11_spill]] %s1173_s12  ;;  %p976_p8 = por %p58_p6, %p57_p5 }
  0x12   : > { %p980_p9 = por %p209_p7, %p51_p1  ;;  %s39_s18 = ssub.s32 %s862_s30, %s1173_s12 }
  0x13   : > { %p215_p10 = scmp.eq.s32.totalorder %s618_s10, 3  ;;  %s41_s19 = sor.u32 %s40_s14, %s39_s18 }
  0x14   : > { %s1149_s17 = scalar_select %p980_p9, 1, 0 }
  0x15   : > { %p42_p11 = scmp.eq.s32.totalorder %s41_s19, 0  ;;  %p986_p12 = por %p215_p10, %p57_p5 }
  0x16   : > { %1150 = sst [smem:[#allocation12_spill]] %s1149_s17  ;;  %p662_p13 = scmp.lt.s32.totalorder %s866_s8, 4 }
  0x17   : > { %s1151_s20 = scalar_select %p986_p12, 1, 0 }
  0x18   : > { %s253_s21 = sand.u32 1, %s846_s26   ;;  %s622_s9 = sshll.u32 %s862_s30, 3 }
  0x19   : > { %1152 = sst [smem:[#allocation13_spill]] %s1151_s20  ;;  %s621_s23 = sshll.u32 %s253_s21, 5 }
  0x1a   : > { %s993_s22 = scalar_select %p42_p11, %s846_s26, %s44_s13  }
  0x1b   : > { %s261_s11 = sadd.s32 %s858_s29, %s622_s9  ;;  %s257_s24 = scalar_lea.vmem [#allocation2], %s621_s23 }
  0x1c   : > { %1153 = sst [smem:[#allocation14_spill]] %s993_s22  ;;  %s266_s17 = sshll.u32 %s257_s24, 4  ;;  %s267_s17 = int_to_ptr.vmem [resolvable:$true] %s266_s17 }
  0x1d   : > { %s623_s12 = sshll.u32 %s261_s11, 3  ;;  %p655_p0 = pnand %p662_p13, %p968_p3 }
  0x1e   : > { %s263_s18 = scalar_lea.hbm %s1128_s0, %s623_s12  ;;  %s254_s20 = scalar_lea.sflag [#allocation3], %s253_s21 }
  0x1f   : > { %s264_s19 = sshll.u32 %s263_s18, 4  ;;  %s868_s13 = smov 256   ;;  %s265_s19 = int_to_ptr.hbm [resolvable:$true] %s264_s19 }
  0x20   : > { %s869_s22 = smov 128   ;;  %s870_s26 = smov 8  }
  0x21   : > { %657 = dma.hbm_to_vmem [thread:$0]  (!%p655_p0), %s265_s19, 512, %s267_s17, %s254_s20, %s868_s13, %s869_s22, %s870_s26  }
  0x22   : > { %p624_p1 = scmp.ge.s32.totalorder %s866_s8, 1  ;;  %p274_p2 = scmp.lt.s32.totalorder %s866_s8, 5 }
  0x24   : > { %p275_p4 = pnand %p624_p1, %p274_p2 }
  0x25   : > { %s1005_s24 = sand.u32 (!%p275_p4), 1, %s842_s25  }
  0x26   : > { %278 = sbr.rel (%p275_p4) target bundleno = 512 (0x200), region = 48  ;;  %s625_s11 = sshll.u32 (!%p275_p4), %s1005_s24, 5 }
  0x27   : > { %s281_s12 = scalar_lea.sflag (!%p275_p4), [#allocation3], %s1005_s24  ;;  %s284_s15 = scalar_lea.vmem (!%p275_p4), [#allocation2], %s625_s11 }
  0x2b   : > { %829 = dma.done.wait (%p976_p8), %s281_s12, 512  }
  0x2c   : > { %831 = vsyncadd (%p976_p8), %s281_s12, 4294966784  ;;  %v871_v0 = vmov 0   ;;  %v319_v1 = vld [vmem:[%s284_s15 + $0x18] sm:$0xff]  ;;  %v318_v2 = vld [vmem:[%s284_s15 + $0x10] sm:$0xff]  ;;  %vm348_vm0 = vcmask 261120   ;;  %s638_s10 = sshll.u32 %s854_s28, 2 }
  0x2d   : > { %735 = vset.pattern.permute.xlu0 %v871_v0  ;;  %736 = vset.pattern.permute.xlu1 %v871_v0  ;;  %v327_v3 = vld [vmem:[%s1130_s2 + $0x18] sm:$0xff]  ;;  %v317_v4 = vld [vmem:[%s284_s15 + $0x8] sm:$0xff]  ;;  %v316_v6 = vld [vmem:[%s284_s15] sm:$0xff]  ;;  %s523_s14 = sadd.s32 %s850_s27, %s638_s10  ;;  %s626_s18 = sshll.u32 %s1005_s24, 4 }
  0x2e   : > { %737 = vset.pattern.permute.xlu2 %v871_v0  ;;  %642 = vmatpush.msra.mxu3 %v319_v1  ;;  %v325_v5 = vld [vmem:[%s1130_s2 + $0x8] sm:$0xff]  ;;  %v320_v8 = vld [vmem:[%s1129_s1] sm:$0xff]  ;;  %v326_v9 = vld [vmem:[%s1130_s2 + $0x10] sm:$0xff]  ;;  %s639_s19 = sshll.u32 %s523_s14, 3  ;;  %s315_s26 = scalar_lea.vmem [#allocation5], %s626_s18 }
  0x2f   : > { %373 = vmatpush.msra.mxu0 %v319_v1  ;;  %345 = vperm.xlu0 %735, %v327_v3   ;;  %v321_v7 = vld [vmem:[%s1129_s1 + $0x8] sm:$0xff]  ;;  %v324_v10 = vld [vmem:[%s1130_s2] sm:$0xff]  ;;  %v322_v11 = vld [vmem:[%s1129_s1 + $0x10] sm:$0xff]  ;;  %s525_s12 = scalar_lea.hbm %s1135_s7, %s639_s19  ;;  %s526_s17 = sshll.u32 %s315_s26, 4  ;;  %s527_s17 = int_to_ptr.vmem [resolvable:$true] %s526_s17 }
  0x30   : > { %643 = vmatpush.msra.mxu3 %v318_v2  ;;  %335 = vperm.xlu1 %736, %v325_v5   ;;  %v399_v12 = vld [vmem:[%s1132_s4 + $0x8] sm:$0xff]  ;;  %v398_v13 = vld [vmem:[%s1132_s4] sm:$0xff]  ;;  %v323_v14 = vld [vmem:[%s1129_s1 + $0x18] sm:$0xff]  ;;  %s528_s20 = sshll.u32 %s525_s12, 4  ;;  %s513_s27 = scalar_lea.sflag [#allocation4], %s1005_s24  ;;  %s529_s20 = int_to_ptr.hbm [resolvable:$true] %s528_s20 }
  0x31   : > { %374 = vmatpush.msra.mxu0 %v318_v2  ;;  %v470_v15 = vld [vmem:[%s1134_s6 + $0x8] sm:$0xff]  ;;  %v401_v20 = vld [vmem:[%s1132_s4 + $0x18] sm:$0xff]  ;;  %v400_v28 = vld [vmem:[%s1132_s4 + $0x10] sm:$0xff]  ;;  %s782_s28 = sshra.s32 %s529_s20, 4  ;;  %s788_s23 = scalar_lea.hbm %s1135_s7, 64  ;;  %s783_s28 = int_to_ptr.hbm [resolvable:$true] %s782_s28 }
  0x32   : > { %644 = vmatpush.msra.mxu3 %v317_v4  ;;  %419 = vperm.xlu2 %737, %v401_v20   ;;  %v394_v34 = vld [vmem:[%s1131_s3] sm:$0xff]  ;;  %v395_v35 = vld [vmem:[%s1131_s3 + $0x8] sm:$0xff]  ;;  %v396_v37 = vld [vmem:[%s1131_s3 + $0x10] sm:$0xff]  ;;  %s784_s21 = scalar_lea.hbm %s783_s28, 16  ;;  %p789_p7 = scmp.lt.s32.totalorder %s783_s28, %s1135_s7 }
  0x33   : > { %375 = vmatpush.msra.mxu0 %v317_v4  ;;  %v469_v36 = vld [vmem:[%s1134_s6] sm:$0xff]  ;;  %v397_v38 = vld [vmem:[%s1131_s3 + $0x18] sm:$0xff]  ;;  %v468_v56 = vld [vmem:[%s1133_s5 + $0x8] sm:$0xff]  ;;  %p785_p3 = scmp.ne.s32.totalorder %s783_s28, %s784_s21  ;;  %p790_p8 = scmp.lt.s32.totalorder %s788_s23, %s784_s21 }
  0x34   : > { %645 = vmatpush.msra.mxu3 %v316_v6  ;;  %v467_v55 = vld [vmem:[%s1133_s5] sm:$0xff] }
  0x35   : > { %628 = vmatmul.msk.f32.vlgmr.msra.gmra.mxu3 %vm348_vm0, %v321_v7  ;;  %376 = vmatpush.msra.mxu0 %v316_v6  ;;  %p786_p5 = pnand %p785_p3, %p980_p9  ;;  %p791_p10 = por %p790_p8, %p789_p7 }
  0x36   : > { %627 = vmatmul.msk.f32.vlgmr.msra.gmra.mxu0 %vm348_vm0, %v320_v8 }
  0x37   : > { %340 = vperm.xlu0 %735, %v326_v9   ;;  %p787_p6 = pneg %p786_p5 }
  0x38   : > { %330 = vperm.xlu1 %736, %v324_v10  }
  0x39   : > { %p792_p11 = pnand %p791_p10, %p787_p6 }
  0x3a   : > { %414 = vperm.xlu2 %737, %v400_v28  }
  0x3d   : > { %629 = vmatmul.msk.f32.gmra.mxu3 %vm348_vm0, %v322_v11 }
  0x3f   : > { %409 = vperm.xlu0 %735, %v399_v12  }
  0x40   : > { %404 = vperm.xlu1 %736, %v398_v13  }
  0x42   : > { %473 = vperm.xlu2 %737, %v469_v36  }
  0x45   : > { %630 = vmatmul.msk.f32.gmra.mxu3 %vm348_vm0, %v323_v14 }
  0x47   : > { %478 = vperm.xlu0 %735, %v470_v15  }
  0x8c   : > { %v420_v40 = vpop.permute.xlu2 %419 }
  0x94   : > { %v415_v42 = vpop.permute.xlu2 %414 }
  0x9c   : > { %v474_v57 = vpop.permute.xlu2 %473 }
  0xa1   : > { %v346_v17 = vpop.permute.xlu0 %345 }
  0xa2   : > { %v336_v19 = vpop.permute.xlu1 %335 }
  0xa9   : > { %v341_v21 = vpop.permute.xlu0 %340 }
  0xaa   : > { %v331_v29 = vpop.permute.xlu1 %330 }
  0xb1   : > { %v410_v46 = vpop.permute.xlu0 %409 }
  0xb2   : > { %v405_v50 = vpop.permute.xlu1 %404 }
  0xb3   : > { %v378_v25 = vpop.f32.mrf.mxu0 }
  0xb4   : > { %v379_v31 = vadd.f32 %v378_v25, %v331_v29 }
  0xb6   : > { %v390_v33 = vmax.f32 %v379_v31, 0.0 }
  0xb8   : > { %v381_v16 = vpop.f32.mrf.mxu3 }
  0xb9   : > { %v382_v26 = vadd.f32 %v381_v16, %v336_v19  ;;  %v479_v60 = vpop.permute.xlu0 %478 }
  0xbb   : > { %v391_v32 = vmax.f32 %v382_v26, 0.0 }
  0xc0   : > { %v384_v18 = vpop.f32.mrf.mxu3 }
  0xc1   : > { %v385_v23 = vadd.f32 %v384_v18, %v341_v21 }
  0xc3   : > { %v392_v30 = vmax.f32 %v385_v23, 0.0 }
  0xc8   : > { %v387_v22 = vpop.f32.mrf.mxu3 }
  0xc9   : > { %v388_v24 = vadd.f32 %v387_v22, %v346_v17 }
  0xcb   : > { %v393_v27 = vmax.f32 %v388_v24, 0.0 }
  0xcd   : > { %446 = vmatpush.msrb.mxu0 %v393_v27  ;;  %646 = vmatpush.msra.mxu1 %v393_v27 }
  0xcf   : > { %447 = vmatpush.msrb.mxu0 %v392_v30  ;;  %647 = vmatpush.msra.mxu1 %v392_v30 }
  0xd1   : > { %448 = vmatpush.msrb.mxu0 %v391_v32  ;;  %648 = vmatpush.msra.mxu1 %v391_v32 }
  0xd3   : > { %449 = vmatpush.msrb.mxu0 %v390_v33  ;;  %649 = vmatpush.msra.mxu1 %v390_v33 }
  0xd4   : > { %631 = vmatmul.msk.f32.vlgmr.msrb.gmra.mxu0 %vm348_vm0, %v394_v34  ;;  %632 = vmatmul.msk.f32.vlgmr.msra.gmra.mxu1 %vm348_vm0, %v395_v35 }
  0xdc   : > { %633 = vmatmul.msk.f32.gmra.mxu1 %vm348_vm0, %v396_v37 }
  0xe4   : > { %634 = vmatmul.msk.f32.gmra.mxu1 %vm348_vm0, %v397_v38 }
 0x151   : > { %v454_v39 = vpop.f32.mrf.mxu1  ;;  %v451_v47 = vpop.f32.mrf.mxu0 }
 0x152   : > { %v455_v48 = vadd.f32 %v454_v39, %v410_v46  ;;  %v452_v51 = vadd.f32 %v451_v47, %v405_v50 }
 0x154   : > { %v464_v53 = vmax.f32 %v455_v48, 0.0  ;;  %v463_v54 = vmax.f32 %v452_v51, 0.0 }
 0x159   : > { %v457_v41 = vpop.f32.mrf.mxu1 }
 0x15a   : > { %v458_v44 = vadd.f32 %v457_v41, %v415_v42 }
 0x15c   : > { %v465_v52 = vmax.f32 %v458_v44, 0.0 }
 0x161   : > { %v460_v43 = vpop.f32.mrf.mxu1 }
 0x162   : > { %v461_v45 = vadd.f32 %v460_v43, %v420_v40 }
 0x164   : > { %v466_v49 = vmax.f32 %v461_v45, 0.0 }
 0x166   : > { %499 = vmatpush.msra.mxu2 %v466_v49 }
 0x168   : > { %500 = vmatpush.msra.mxu2 %v465_v52 }
 0x16a   : > { %501 = vmatpush.msra.mxu2 %v464_v53 }
 0x16c   : > { %502 = vmatpush.msra.mxu2 %v463_v54 }
 0x16d   : > { %635 = vmatmul.msk.f32.vlgmr.msra.gmra.mxu2 %vm348_vm0, %v467_v55 }
 0x175   : > { %636 = vmatmul.msk.f32.gmra.mxu2 %vm348_vm0, %v468_v56 }
 0x1f0   : > { %v504_v58 = vpop.f32.mrf.mxu2 }
 0x1f1   : > { %v505_v59 = vadd.f32 %v504_v58, %v474_v57 }
 0x1f3   : > { %510 = vst [vmem:[%s315_s26] sm:$0xff] %v505_v59 }
 0x1f8   : > { %v507_v61 = vpop.f32.mrf.mxu2 }
 0x1f9   : > { %v508_v62 = vadd.f32 %v507_v61, %v479_v60 }
 0x1fb   : > { %511 = vst [vmem:[%s315_s26 + $0x8] sm:$0xff] %v508_v62 }
 0x1fc   : > { %795 = shalt.err (!%p792_p11)
}
 0x1fd   : > { %s872_s24 = smov 128   ;;  %s873_s14 = smov 256  }
 0x1fe   : > { %s874_s18 = smov 8  }
 0x1ff   : > { %652 = dma.vmem_to_hbm [thread:$0]  (%p980_p9), %s527_s17, 256, %s529_s20, %s513_s27, %s872_s24, %s873_s14, %s874_s18  }
 0x200 PF: > { %s1155_s19 = sld [smem:[#allocation8_spill]]  ;;  %p663_p13 = scmp.ge.s32.totalorder %s866_s8, 2 }
 0x202   : > { %p659_p0 = pnand %p663_p13, %p986_p12 }
 0x204   : > { %p660_p1 = pneg %p659_p0 }
 0x206   : > { %s543_s11 = sand.u32 1, %s1155_s19  }
 0x207   : > { %s544_s12 = scalar_lea.sflag [#allocation4], %s543_s11 }
 0x208   : > { %833 = dma.done.wait (%p660_p1), %s544_s12, 256  }
 0x209   : > { %835 = vsyncadd (%p660_p1), %s544_s12, 4294967040  ;;  %s23_s8 = sadd.s32 1, %s866_s8   ;;  %s1157_s26 = sld [smem:[#allocation9_spill]] }
 0x20a   : > { %p20_p2 = scmp.ge.s32.totalorder %s23_s8, 6   ;;  %s1158_s28 = sld [smem:[#allocation14_spill]] }
 0x20b   : > { %s1159_s15 = sld [smem:[#allocation10_spill]]  ;;  %s1161_s24 = smov %s842_s25 }
 0x20c   : > { %s1160_s17 = sld [smem:[#allocation11_spill]]  ;;  %s1164_s27 = smov %s858_s29 }
 0x20e   :  { %22 = sbr.rel (!%p20_p2) target bundleno = 7 (0x7), region = 93 }
 0x20f   : > { %s1162_s25 = smov %s1157_s26 }
 0x210   : > { %s1163_s26 = smov %s1158_s28  ;;  %s1165_s28 = smov %s862_s30 }
 0x211   : > { %s1166_s29 = smov %s1159_s15 }
 0x212   : > { %s1167_s30 = smov %s1160_s17 }
 0x213   :  { %550 = vsyncpa [#allocation3], 1 }
 0x214   :  { %552 = vsyncpa [#allocation3 + $0x1], 1 }
 0x215   :  { %553 = vsyncpa [#allocation4], 1 }
 0x216   :  { %555 = vsyncpa [#allocation4 + $0x1], 1 }

</bundles_post_ra>
